<compile_context>
chip_gen: v5e
topology: v5e:2x2
jax: 0.10.0
libtpu: 0.0.40
codegen_flags: <defaults>
</compile_context>

<pallas_src>
import functools

import jax
import jax.numpy as jnp
from jax import lax
from jax.experimental import pallas as pl
from jax.experimental.pallas import tpu as pltpu


def _round_up(x, m):
    return ((x + m - 1) // m) * m


def _erf_poly(z):
    # Abramowitz & Stegun 7.1.26, max abs error 1.5e-7 (exact-GELU semantics
    # preserved well below fp32 test tolerance).  Uses only exp / mul / select.
    az = jnp.abs(z)
    t = 1.0 / (1.0 + 0.3275911 * az)
    poly = ((((1.061405429 * t - 1.453152027) * t + 1.421413741) * t
             - 0.284496736) * t + 0.254829592) * t
    e = 1.0 - poly * jnp.exp(-az * az)
    return jnp.where(z >= 0.0, e, -e)


def _pos_conv_ln_kernel(x_ref, halo_ref, w_ref, b_ref, ln_g_ref, ln_b_ref,
                        o_ref, win_ref, *, K, tT, HR, pad, groups, cg, eps):
    # Stitch the contiguous conv window (current tile + trailing halo rows) into
    # VMEM scratch once -> the activation is only DMA'd from HBM once per tile.
    win_ref[0:tT, :] = x_ref[0].astype(jnp.float32)
    win_ref[tT:tT + HR, :] = halo_ref[0, 0].astype(jnp.float32)

    # Grouped conv as per-group (tT, cg) x (cg, cg) MXU matmuls over K taps
    # (compact weights, no dense block-diagonal).  K is small -> full unroll.
    parts = []
    for grp in range(groups):
        c0 = grp * cg
        acc_g = jnp.zeros((tT, cg), jnp.float32)
        for k in range(K):
            xk = win_ref[k:k + tT, c0:c0 + cg]
            acc_g = acc_g + jnp.dot(xk, w_ref[k, grp],
                                    preferred_element_type=jnp.float32)
        parts.append(acc_g)
    acc = jnp.concatenate(parts, axis=-1) + b_ref[...]          # (tT, D)

    # Exact GELU (PyTorch nn.GELU default, approximate='none').
    pos = 0.5 * acc * (1.0 + _erf_poly(acc * 0.7071067811865476))

    # Residual: the x tile is rows [pad, pad + tT) of the window.
    out = win_ref[pad:pad + tT, :] + pos

    # LayerNorm over d_model (biased variance), f32 math.
    mean = jnp.mean(out, axis=-1, keepdims=True)
    var = jnp.mean((out - mean) * (out - mean), axis=-1, keepdims=True)
    normed = (out - mean) * lax.rsqrt(var + eps)
    o_ref[0] = (normed * ln_g_ref[...] + ln_b_ref[...]).astype(o_ref.dtype)


def transformer_encoder_forward(x, params, *, kernel_size, groups,
                                time_tile=256, eps=1e-5):
    B, T, D = x.shape
    K = kernel_size
    pad = K // 2
    assert D % groups == 0
    cg = D // groups

    # weight_norm (dim=2): w = g * v / ||v||, norm over (out, in) per tap, f32.
    v = params["conv_v"].astype(jnp.float32)
    g = params["conv_g"].astype(jnp.float32)
    w = g * v * lax.rsqrt(jnp.sum(v * v, axis=(0, 1), keepdims=True))
    # Compact grouped weights wc[k, grp, c_in, c_out] (single reshape+transpose).
    wc = jnp.transpose(w.reshape(groups, cg, cg, K), (3, 0, 2, 1))

    # Time tiling (sublane aligned; 128/256-friendly for real seq lengths).
    tT = min(_round_up(time_tile, 8), _round_up(T, 8))
    assert K - 1 <= tT, "time tile must cover the conv halo"
    nT = pl.cdiv(T, tT)
    HR = _round_up(max(K - 1, 1), 8)            # halo rows, sublane aligned
    Lp = (nT + 1) * tT                          # padded time length
    x_pad = jnp.pad(x, ((0, 0), (pad, Lp - pad - T), (0, 0)))
    # Trailing halo of each tile = first HR rows of the next tile (tiny copy).
    halo = x_pad.reshape(B, nT + 1, tT, D)[:, 1:, :HR, :]

    conv_b = params["conv_b"].reshape(1, D).astype(jnp.float32)
    ln_g = params["ln_g"].reshape(1, D).astype(jnp.float32)
    ln_b = params["ln_b"].reshape(1, D).astype(jnp.float32)

    kernel = functools.partial(_pos_conv_ln_kernel, K=K, tT=tT, HR=HR, pad=pad,
                               groups=groups, cg=cg, eps=float(eps))

    # Explicit scoped-VMEM budget (double-buffered blocks + scratch + margin).
    blk_bytes = 4 * (2 * (tT * D + HR * D + tT * D)
                     + 2 * K * groups * cg * cg
                     + (tT + HR) * D + 6 * D)
    vmem_limit = int(min(max(blk_bytes + (16 << 20), 32 << 20), 128 << 20))

    flops = 2 * B * nT * tT * K * groups * cg * cg
    bytes_accessed = 4 * (x_pad.size + halo.size + wc.size
                          + B * nT * tT * D + 3 * D)

    out = pl.pallas_call(
        kernel,
        out_shape=jax.ShapeDtypeStruct((B, nT * tT, D), x.dtype),
        grid_spec=pltpu.PrefetchScalarGridSpec(
            num_scalar_prefetch=0,
            grid=(B, nT),
            in_specs=[
                pl.BlockSpec((1, tT, D), lambda b, t: (b, t, 0)),        # x tile
                pl.BlockSpec((1, 1, HR, D), lambda b, t: (b, t, 0, 0)),  # halo
                # TODO(synk): single-buffer the (revisited) weights on v7x.
                pl.BlockSpec((K, groups, cg, cg), lambda b, t: (0, 0, 0, 0)),
                pl.BlockSpec((1, D), lambda b, t: (0, 0)),               # conv b
                pl.BlockSpec((1, D), lambda b, t: (0, 0)),               # LN gamma
                pl.BlockSpec((1, D), lambda b, t: (0, 0)),               # LN beta
            ],
            out_specs=pl.BlockSpec((1, tT, D), lambda b, t: (b, t, 0)),
            scratch_shapes=[pltpu.VMEM((tT + HR, D), jnp.float32)],
        ),
        compiler_params=pltpu.CompilerParams(
            dimension_semantics=("parallel", "parallel"),
            vmem_limit_bytes=vmem_limit),
        cost_estimate=pl.CostEstimate(
            flops=int(flops),
            transcendentals=int(B * nT * tT * D),
            bytes_accessed=int(bytes_accessed)),
    )(x_pad, halo, wc, conv_b, ln_g, ln_b)
    return out[:, :T, :]


def _reference_forward(x, params, *, kernel_size, groups, eps=1e-5):
    """Pure-JAX reference of the same math (correctness check)."""
    B, T, D = x.shape
    K, pad, cg = kernel_size, kernel_size // 2, D // groups
    v = params["conv_v"].astype(jnp.float32)
    g = params["conv_g"].astype(jnp.float32)
    w = g * v / jnp.sqrt(jnp.sum(v * v, axis=(0, 1), keepdims=True))
    wc = jnp.transpose(w.reshape(groups, cg, cg, K), (3, 0, 2, 1))
    x_pad = jnp.pad(x, ((0, 0), (pad, pad), (0, 0)))
    xg = x_pad.reshape(B, T + 2 * pad, groups, cg)
    acc = sum(jnp.einsum("btgc,gcd->btgd", xg[:, k:k + T], wc[k],
                         precision=jax.lax.Precision.HIGHEST)
              for k in range(K))
    acc = acc.reshape(B, T, D) + params["conv_b"]
    pos = 0.5 * acc * (1.0 + jax.scipy.special.erf(acc / jnp.sqrt(2.0)))
    out = x + pos
    mean = out.mean(-1, keepdims=True)
    var = ((out - mean) ** 2).mean(-1, keepdims=True)
    return (out - mean) / jnp.sqrt(var + eps) * params["ln_g"] + params["ln_b"]


if __name__ == "__main__":
    B, T, D = 2, 16, 32          # batch, num_frames, d_model
    KERNEL_SIZE, GROUPS = 3, 2   # pos_embedding config

    key = jax.random.PRNGKey(0)
    kx, kv, kg, kb, klg, klb = jax.random.split(key, 6)

    x = jax.random.normal(kx, (B, T, D), dtype=jnp.float32)
    params = {
        "conv_v": jax.random.normal(kv, (D, D // GROUPS, KERNEL_SIZE),
                                    dtype=jnp.float32) * 0.1,
        "conv_g": jax.random.normal(kg, (1, 1, KERNEL_SIZE),
                                    dtype=jnp.float32) * 0.5 + 1.0,
        "conv_b": jax.random.normal(kb, (D,), dtype=jnp.float32) * 0.1,
        "ln_g": jax.random.normal(klg, (D,), dtype=jnp.float32) * 0.1 + 1.0,
        "ln_b": jax.random.normal(klb, (D,), dtype=jnp.float32) * 0.1,
    }

    out = transformer_encoder_forward(x, params, kernel_size=KERNEL_SIZE,
                                      groups=GROUPS)
    out = jax.block_until_ready(out)

    ref = _reference_forward(x, params, kernel_size=KERNEL_SIZE, groups=GROUPS)
    assert out.shape == (B, T, D)
    err = float(jnp.max(jnp.abs(out - ref)))
    assert jnp.allclose(out, ref, atol=5e-3, rtol=5e-3), f"mismatch: {err}"
    print("KERNEL_OK")
</pallas_src>

<mosaic_0001>
module attributes {stable_mosaic.version = 11 : i64} {
  func.func @_pos_conv_ln_kernel(%arg0: i32, %arg1: i32, %arg2: memref<1x16x32xf32, #tpu.memory_space<vmem>>, %arg3: memref<1x1x8x32xf32, #tpu.memory_space<vmem>>, %arg4: memref<3x2x16x16xf32, #tpu.memory_space<vmem>>, %arg5: memref<1x32xf32, #tpu.memory_space<vmem>>, %arg6: memref<1x32xf32, #tpu.memory_space<vmem>>, %arg7: memref<1x32xf32, #tpu.memory_space<vmem>>, %arg8: memref<1x16x32xf32, #tpu.memory_space<vmem>>, %arg9: memref<24x32xf32, #tpu.memory_space<vmem>>) attributes {dimension_semantics = [#tpu.dimension_semantics<parallel>, #tpu.dimension_semantics<parallel>], iteration_bounds = array<i64: 2, 1>, scalar_prefetch = 0 : i64, scratch_operands = 1 : i64, tpu.core_type = #tpu.core_type<tc>, window_params = [{transform_indices = @transform_0, window_bounds = array<i64: 1, 16, 32>}, {transform_indices = @transform_1, window_bounds = array<i64: 1, 1, 8, 32>}, {pipeline_mode = #tpu.pipeline_mode<synchronous>, transform_indices = @transform_2, window_bounds = array<i64: 3, 2, 16, 16>}, {pipeline_mode = #tpu.pipeline_mode<synchronous>, transform_indices = @transform_3, window_bounds = array<i64: 1, 32>}, {pipeline_mode = #tpu.pipeline_mode<synchronous>, transform_indices = @transform_4, window_bounds = array<i64: 1, 32>}, {pipeline_mode = #tpu.pipeline_mode<synchronous>, transform_indices = @transform_5, window_bounds = array<i64: 1, 32>}, {transform_indices = @transform_6, window_bounds = array<i64: 1, 16, 32>}]} {
    %c0 = arith.constant 0 : index
    %c0_0 = arith.constant 0 : index
    %c0_1 = arith.constant 0 : index
    %0 = vector.load %arg2[%c0, %c0_0, %c0_1] : memref<1x16x32xf32, #tpu.memory_space<vmem>>, vector<1x16x32xf32>
    %1 = vector.shape_cast %0 : vector<1x16x32xf32> to vector<16x32xf32>
    %c0_2 = arith.constant 0 : index
    %c0_3 = arith.constant 0 : index
    %2 = vector.load %arg9[%c0_2, %c0_3] : memref<24x32xf32, #tpu.memory_space<vmem>>, vector<16x32xf32>
    tpu.vector_store %arg9[%c0_2, %c0_3], %1 {strides = array<i32>} : memref<24x32xf32, #tpu.memory_space<vmem>>, vector<16x32xf32>,
    %c0_4 = arith.constant 0 : index
    %c0_5 = arith.constant 0 : index
    %c0_6 = arith.constant 0 : index
    %c0_7 = arith.constant 0 : index
    %3 = vector.load %arg3[%c0_4, %c0_5, %c0_6, %c0_7] : memref<1x1x8x32xf32, #tpu.memory_space<vmem>>, vector<1x1x8x32xf32>
    %4 = vector.shape_cast %3 : vector<1x1x8x32xf32> to vector<8x32xf32>
    %c16 = arith.constant 16 : index
    %c0_8 = arith.constant 0 : index
    %5 = vector.load %arg9[%c16, %c0_8] : memref<24x32xf32, #tpu.memory_space<vmem>>, vector<8x32xf32>
    tpu.vector_store %arg9[%c16, %c0_8], %4 {strides = array<i32>} : memref<24x32xf32, #tpu.memory_space<vmem>>, vector<8x32xf32>,
    %cst = arith.constant 0.000000e+00 : f32
    %6 = vector.broadcast %cst : f32 to vector<16x16xf32>
    %c0_9 = arith.constant 0 : index
    %c0_10 = arith.constant 0 : index
    %7 = vector.load %arg9[%c0_9, %c0_10] : memref<24x32xf32, #tpu.memory_space<vmem>>, vector<16x16xf32>
    %c0_11 = arith.constant 0 : index
    %c0_12 = arith.constant 0 : index
    %c0_13 = arith.constant 0 : index
    %c0_14 = arith.constant 0 : index
    %8 = vector.load %arg4[%c0_11, %c0_12, %c0_13, %c0_14] : memref<3x2x16x16xf32, #tpu.memory_space<vmem>>, vector<1x1x16x16xf32>
    %9 = vector.shape_cast %8 : vector<1x1x16x16xf32> to vector<16x16xf32>
    %cst_15 = arith.constant dense<0.000000e+00> : vector<16x16xf32>
    %10 = tpu.matmul %7, %9, %cst_15 {dimension_numbers = #tpu.dot_dimension_numbers<[1], [0], [0], [1], [0, 0, 1, 1], [], []>} : vector<16x16xf32>, vector<16x16xf32>, vector<16x16xf32> -> vector<16x16xf32>
    %11 = arith.addf %6, %10 : vector<16x16xf32>
    %c1 = arith.constant 1 : index
    %c0_16 = arith.constant 0 : index
    %12 = vector.load %arg9[%c1, %c0_16] : memref<24x32xf32, #tpu.memory_space<vmem>>, vector<16x16xf32>
    %c1_17 = arith.constant 1 : index
    %c0_18 = arith.constant 0 : index
    %c0_19 = arith.constant 0 : index
    %c0_20 = arith.constant 0 : index
    %13 = vector.load %arg4[%c1_17, %c0_18, %c0_19, %c0_20] : memref<3x2x16x16xf32, #tpu.memory_space<vmem>>, vector<1x1x16x16xf32>
    %14 = vector.shape_cast %13 : vector<1x1x16x16xf32> to vector<16x16xf32>
    %cst_21 = arith.constant dense<0.000000e+00> : vector<16x16xf32>
    %15 = tpu.matmul %12, %14, %cst_21 {dimension_numbers = #tpu.dot_dimension_numbers<[1], [0], [0], [1], [0, 0, 1, 1], [], []>} : vector<16x16xf32>, vector<16x16xf32>, vector<16x16xf32> -> vector<16x16xf32>
    %16 = arith.addf %11, %15 : vector<16x16xf32>
    %c2 = arith.constant 2 : index
    %c0_22 = arith.constant 0 : index
    %17 = vector.load %arg9[%c2, %c0_22] : memref<24x32xf32, #tpu.memory_space<vmem>>, vector<16x16xf32>
    %c2_23 = arith.constant 2 : index
    %c0_24 = arith.constant 0 : index
    %c0_25 = arith.constant 0 : index
    %c0_26 = arith.constant 0 : index
    %18 = vector.load %arg4[%c2_23, %c0_24, %c0_25, %c0_26] : memref<3x2x16x16xf32, #tpu.memory_space<vmem>>, vector<1x1x16x16xf32>
    %19 = vector.shape_cast %18 : vector<1x1x16x16xf32> to vector<16x16xf32>
    %cst_27 = arith.constant dense<0.000000e+00> : vector<16x16xf32>
    %20 = tpu.matmul %17, %19, %cst_27 {dimension_numbers = #tpu.dot_dimension_numbers<[1], [0], [0], [1], [0, 0, 1, 1], [], []>} : vector<16x16xf32>, vector<16x16xf32>, vector<16x16xf32> -> vector<16x16xf32>
    %21 = arith.addf %16, %20 : vector<16x16xf32>
    %cst_28 = arith.constant 0.000000e+00 : f32
    %22 = vector.broadcast %cst_28 : f32 to vector<16x16xf32>
    %c0_29 = arith.constant 0 : index
    %c16_30 = arith.constant 16 : index
    %23 = vector.load %arg9[%c0_29, %c16_30] : memref<24x32xf32, #tpu.memory_space<vmem>>, vector<16x16xf32>
    %c0_31 = arith.constant 0 : index
    %c1_32 = arith.constant 1 : index
    %c0_33 = arith.constant 0 : index
    %c0_34 = arith.constant 0 : index
    %24 = vector.load %arg4[%c0_31, %c1_32, %c0_33, %c0_34] : memref<3x2x16x16xf32, #tpu.memory_space<vmem>>, vector<1x1x16x16xf32>
    %25 = vector.shape_cast %24 : vector<1x1x16x16xf32> to vector<16x16xf32>
    %cst_35 = arith.constant dense<0.000000e+00> : vector<16x16xf32>
    %26 = tpu.matmul %23, %25, %cst_35 {dimension_numbers = #tpu.dot_dimension_numbers<[1], [0], [0], [1], [0, 0, 1, 1], [], []>} : vector<16x16xf32>, vector<16x16xf32>, vector<16x16xf32> -> vector<16x16xf32>
    %27 = arith.addf %22, %26 : vector<16x16xf32>
    %c1_36 = arith.constant 1 : index
    %c16_37 = arith.constant 16 : index
    %28 = vector.load %arg9[%c1_36, %c16_37] : memref<24x32xf32, #tpu.memory_space<vmem>>, vector<16x16xf32>
    %c1_38 = arith.constant 1 : index
    %c1_39 = arith.constant 1 : index
    %c0_40 = arith.constant 0 : index
    %c0_41 = arith.constant 0 : index
    %29 = vector.load %arg4[%c1_38, %c1_39, %c0_40, %c0_41] : memref<3x2x16x16xf32, #tpu.memory_space<vmem>>, vector<1x1x16x16xf32>
    %30 = vector.shape_cast %29 : vector<1x1x16x16xf32> to vector<16x16xf32>
    %cst_42 = arith.constant dense<0.000000e+00> : vector<16x16xf32>
    %31 = tpu.matmul %28, %30, %cst_42 {dimension_numbers = #tpu.dot_dimension_numbers<[1], [0], [0], [1], [0, 0, 1, 1], [], []>} : vector<16x16xf32>, vector<16x16xf32>, vector<16x16xf32> -> vector<16x16xf32>
    %32 = arith.addf %27, %31 : vector<16x16xf32>
    %c2_43 = arith.constant 2 : index
    %c16_44 = arith.constant 16 : index
    %33 = vector.load %arg9[%c2_43, %c16_44] : memref<24x32xf32, #tpu.memory_space<vmem>>, vector<16x16xf32>
    %c2_45 = arith.constant 2 : index
    %c1_46 = arith.constant 1 : index
    %c0_47 = arith.constant 0 : index
    %c0_48 = arith.constant 0 : index
    %34 = vector.load %arg4[%c2_45, %c1_46, %c0_47, %c0_48] : memref<3x2x16x16xf32, #tpu.memory_space<vmem>>, vector<1x1x16x16xf32>
    %35 = vector.shape_cast %34 : vector<1x1x16x16xf32> to vector<16x16xf32>
    %cst_49 = arith.constant dense<0.000000e+00> : vector<16x16xf32>
    %36 = tpu.matmul %33, %35, %cst_49 {dimension_numbers = #tpu.dot_dimension_numbers<[1], [0], [0], [1], [0, 0, 1, 1], [], []>} : vector<16x16xf32>, vector<16x16xf32>, vector<16x16xf32> -> vector<16x16xf32>
    %37 = arith.addf %32, %36 : vector<16x16xf32>
    %38 = tpu.concatenate %21, %37 in 1 : vector<16x16xf32>, vector<16x16xf32> -> vector<16x32xf32>
    %c0_50 = arith.constant 0 : index
    %c0_51 = arith.constant 0 : index
    %39 = vector.load %arg5[%c0_50, %c0_51] : memref<1x32xf32, #tpu.memory_space<vmem>>, vector<1x32xf32>
    %40 = vector.broadcast %39 : vector<1x32xf32> to vector<16x32xf32>
    %41 = arith.addf %38, %40 : vector<16x32xf32>
    %cst_52 = arith.constant 5.000000e-01 : f32
    %42 = vector.broadcast %cst_52 : f32 to vector<16x32xf32>
    %43 = arith.mulf %42, %41 : vector<16x32xf32>
    %cst_53 = arith.constant 0.707106769 : f32
    %44 = vector.broadcast %cst_53 : f32 to vector<16x32xf32>
    %45 = arith.mulf %41, %44 : vector<16x32xf32>
    %46 = math.absf %45 : vector<16x32xf32>
    %cst_54 = arith.constant 0.327591091 : f32
    %47 = vector.broadcast %cst_54 : f32 to vector<16x32xf32>
    %48 = arith.mulf %47, %46 : vector<16x32xf32>
    %cst_55 = arith.constant 1.000000e+00 : f32
    %49 = vector.broadcast %cst_55 : f32 to vector<16x32xf32>
    %50 = arith.addf %49, %48 : vector<16x32xf32>
    %cst_56 = arith.constant 1.000000e+00 : f32
    %51 = vector.broadcast %cst_56 : f32 to vector<16x32xf32>
    %52 = arith.divf %51, %50 : vector<16x32xf32>
    %cst_57 = arith.constant 1.06140542 : f32
    %53 = vector.broadcast %cst_57 : f32 to vector<16x32xf32>
    %54 = arith.mulf %53, %52 : vector<16x32xf32>
    %cst_58 = arith.constant 1.45315206 : f32
    %55 = vector.broadcast %cst_58 : f32 to vector<16x32xf32>
    %56 = arith.subf %54, %55 : vector<16x32xf32>
    %57 = arith.mulf %56, %52 : vector<16x32xf32>
    %cst_59 = arith.constant 1.42141378 : f32
    %58 = vector.broadcast %cst_59 : f32 to vector<16x32xf32>
    %59 = arith.addf %57, %58 : vector<16x32xf32>
    %60 = arith.mulf %59, %52 : vector<16x32xf32>
    %cst_60 = arith.constant 0.284496725 : f32
    %61 = vector.broadcast %cst_60 : f32 to vector<16x32xf32>
    %62 = arith.subf %60, %61 : vector<16x32xf32>
    %63 = arith.mulf %62, %52 : vector<16x32xf32>
    %cst_61 = arith.constant 0.254829586 : f32
    %64 = vector.broadcast %cst_61 : f32 to vector<16x32xf32>
    %65 = arith.addf %63, %64 : vector<16x32xf32>
    %66 = arith.mulf %65, %52 : vector<16x32xf32>
    %cst_62 = arith.constant 0.000000e+00 : f32
    %67 = vector.broadcast %cst_62 : f32 to vector<16x32xf32>
    %68 = arith.subf %67, %46 : vector<16x32xf32>
    %69 = arith.mulf %68, %46 : vector<16x32xf32>
    %70 = math.exp %69 : vector<16x32xf32>
    %71 = arith.mulf %66, %70 : vector<16x32xf32>
    %cst_63 = arith.constant 1.000000e+00 : f32
    %72 = vector.broadcast %cst_63 : f32 to vector<16x32xf32>
    %73 = arith.subf %72, %71 : vector<16x32xf32>
    %cst_64 = arith.constant 0.000000e+00 : f32
    %74 = vector.broadcast %cst_64 : f32 to vector<16x32xf32>
    %75 = arith.cmpf oge, %45, %74 : vector<16x32xf32>
    %cst_65 = arith.constant 0.000000e+00 : f32
    %76 = vector.broadcast %cst_65 : f32 to vector<16x32xf32>
    %77 = arith.subf %76, %73 : vector<16x32xf32>
    %78 = arith.select %75, %73, %77 : vector<16x32xi1>, vector<16x32xf32>
    %cst_66 = arith.constant 1.000000e+00 : f32
    %79 = vector.broadcast %cst_66 : f32 to vector<16x32xf32>
    %80 = arith.addf %79, %78 : vector<16x32xf32>
    %81 = arith.mulf %43, %80 : vector<16x32xf32>
    %c1_67 = arith.constant 1 : index
    %c0_68 = arith.constant 0 : index
    %82 = vector.load %arg9[%c1_67, %c0_68] : memref<24x32xf32, #tpu.memory_space<vmem>>, vector<16x32xf32>
    %83 = arith.addf %82, %81 : vector<16x32xf32>
    %cst_69 = arith.constant dense<0.000000e+00> : vector<16xf32>
    %84 = vector.multi_reduction <add>, %83, %cst_69 [1] : vector<16x32xf32> to vector<16xf32>
    %85 = vector.shape_cast %84 : vector<16xf32> to vector<16x1xf32>
    %cst_70 = arith.constant 3.200000e+01 : f32
    %86 = vector.broadcast %cst_70 : f32 to vector<16x1xf32>
    %87 = arith.divf %85, %86 : vector<16x1xf32>
    %88 = vector.broadcast %87 : vector<16x1xf32> to vector<16x32xf32>
    %89 = arith.subf %83, %88 : vector<16x32xf32>
    %90 = vector.broadcast %87 : vector<16x1xf32> to vector<16x32xf32>
    %91 = arith.subf %83, %90 : vector<16x32xf32>
    %92 = arith.mulf %89, %91 : vector<16x32xf32>
    %cst_71 = arith.constant dense<0.000000e+00> : vector<16xf32>
    %93 = vector.multi_reduction <add>, %92, %cst_71 [1] : vector<16x32xf32> to vector<16xf32>
    %94 = vector.shape_cast %93 : vector<16xf32> to vector<16x1xf32>
    %cst_72 = arith.constant 3.200000e+01 : f32
    %95 = vector.broadcast %cst_72 : f32 to vector<16x1xf32>
    %96 = arith.divf %94, %95 : vector<16x1xf32>
    %97 = vector.broadcast %87 : vector<16x1xf32> to vector<16x32xf32>
    %98 = arith.subf %83, %97 : vector<16x32xf32>
    %cst_73 = arith.constant 9.99999974E-6 : f32
    %99 = vector.broadcast %cst_73 : f32 to vector<16x1xf32>
    %100 = arith.addf %96, %99 : vector<16x1xf32>
    %101 = math.rsqrt %100 : vector<16x1xf32>
    %102 = vector.broadcast %101 : vector<16x1xf32> to vector<16x32xf32>
    %103 = arith.mulf %98, %102 : vector<16x32xf32>
    %c0_74 = arith.constant 0 : index
    %c0_75 = arith.constant 0 : index
    %104 = vector.load %arg6[%c0_74, %c0_75] : memref<1x32xf32, #tpu.memory_space<vmem>>, vector<1x32xf32>
    %105 = vector.broadcast %104 : vector<1x32xf32> to vector<16x32xf32>
    %106 = arith.mulf %103, %105 : vector<16x32xf32>
    %c0_76 = arith.constant 0 : index
    %c0_77 = arith.constant 0 : index
    %107 = vector.load %arg7[%c0_76, %c0_77] : memref<1x32xf32, #tpu.memory_space<vmem>>, vector<1x32xf32>
    %108 = vector.broadcast %107 : vector<1x32xf32> to vector<16x32xf32>
    %109 = arith.addf %106, %108 : vector<16x32xf32>
    %c0_78 = arith.constant 0 : index
    %c0_79 = arith.constant 0 : index
    %c0_80 = arith.constant 0 : index
    %110 = vector.load %arg8[%c0_78, %c0_79, %c0_80] : memref<1x16x32xf32, #tpu.memory_space<vmem>>, vector<1x16x32xf32>
    %111 = vector.shape_cast %110 : vector<1x16x32xf32> to vector<16x32xf32>
    %112 = vector.shape_cast %109 : vector<16x32xf32> to vector<1x16x32xf32>
    tpu.vector_store %arg8[%c0_78, %c0_79, %c0_80], %112 {strides = array<i32>} : memref<1x16x32xf32, #tpu.memory_space<vmem>>, vector<1x16x32xf32>,
    return
  }
  func.func @transform_0(%arg0: i32, %arg1: i32) -> (i32, i32, i32) {
    %c0_i32 = arith.constant 0 : i32
    %c0_i32_0 = arith.constant 0 : i32
    return %arg0, %arg1, %c0_i32 : i32, i32, i32
  }
  func.func @transform_1(%arg0: i32, %arg1: i32) -> (i32, i32, i32, i32) {
    %c0_i32 = arith.constant 0 : i32
    %c0_i32_0 = arith.constant 0 : i32
    %c0_i32_1 = arith.constant 0 : i32
    return %arg0, %arg1, %c0_i32, %c0_i32_0 : i32, i32, i32, i32
  }
  func.func @transform_2(%arg0: i32, %arg1: i32) -> (i32, i32, i32, i32) {
    %c0_i32 = arith.constant 0 : i32
    %c0_i32_0 = arith.constant 0 : i32
    %c0_i32_1 = arith.constant 0 : i32
    %c0_i32_2 = arith.constant 0 : i32
    %c0_i32_3 = arith.constant 0 : i32
    return %c0_i32, %c0_i32_0, %c0_i32_1, %c0_i32_2 : i32, i32, i32, i32
  }
  func.func @transform_3(%arg0: i32, %arg1: i32) -> (i32, i32) {
    %c0_i32 = arith.constant 0 : i32
    %c0_i32_0 = arith.constant 0 : i32
    %c0_i32_1 = arith.constant 0 : i32
    return %c0_i32, %c0_i32_0 : i32, i32
  }
  func.func @transform_4(%arg0: i32, %arg1: i32) -> (i32, i32) {
    %c0_i32 = arith.constant 0 : i32
    %c0_i32_0 = arith.constant 0 : i32
    %c0_i32_1 = arith.constant 0 : i32
    return %c0_i32, %c0_i32_0 : i32, i32
  }
  func.func @transform_5(%arg0: i32, %arg1: i32) -> (i32, i32) {
    %c0_i32 = arith.constant 0 : i32
    %c0_i32_0 = arith.constant 0 : i32
    %c0_i32_1 = arith.constant 0 : i32
    return %c0_i32, %c0_i32_0 : i32, i32
  }
  func.func @transform_6(%arg0: i32, %arg1: i32) -> (i32, i32, i32) {
    %c0_i32 = arith.constant 0 : i32
    %c0_i32_0 = arith.constant 0 : i32
    return %arg0, %arg1, %c0_i32 : i32, i32, i32
  }
}

</mosaic_0001>

<bundles_post_ra>
// kernel: tpu_custom_call.1
= control target key start
LH: loop header
LB: loop body
LE: loop exit
PB: predicated region body
PF: predicated region fallthrough
CT: control target
= control target key end

     0   :  { %s1459_s0 = inlined_call_operand.hbm [shape: f32[2,32,32], index: 0, kind: input, shape index: {}]   ;;  %s1460_s1 = inlined_call_operand.hbm [shape: f32[2,1,8,32], index: 1, kind: input, shape index: {}]   ;;  %s1461_s2 = inlined_call_operand.hbm [shape: f32[3,2,16,16], index: 2, kind: input, shape index: {}]   ;;  %s1462_s3 = inlined_call_operand.vmem [shape: f32[1,32], index: 3, kind: input, shape index: {}]   ;;  %s1463_s4 = inlined_call_operand.vmem [shape: f32[1,32], index: 4, kind: input, shape index: {}]   ;;  %s1464_s5 = inlined_call_operand.vmem [shape: f32[1,32], index: 5, kind: input, shape index: {}]   ;;  %s1465_s6 = inlined_call_operand.hbm [shape: f32[2,16,32], index: 6, kind: output, shape index: {}]  }
   0x1   :  { %1474 = sst [smem:[#allocation20_spill]] %s1461_s2 }
   0x2   :  { %11 = vsyncpa [#allocation4], 0 }
   0x3   :  { %13 = vsyncpa [#allocation4 + $0x1], 0 }
   0x4   :  { %14 = vsyncpa [#allocation7], 0 }
   0x5   :  { %16 = vsyncpa [#allocation7 + $0x1], 0 }
   0x6   :  { %17 = vsyncpa [#allocation5], 0 }
   0x7   :  { %19 = vsyncpa [#allocation5 + $0x1], 0  ;;  %s1235_s21 = smov 0   ;;  %s1237_s22 = smov 0  }
   0x8   :  { %s1239_s23 = smov 0   ;;  %s1241_s24 = smov 0  }
   0x9   :  { %s1243_s25 = smov 0   ;;  %s1245_s26 = smov 0  }
   0xa LB: > { %1475 = sst [smem:[#allocation14_spill]] %s1170_s21  ;;  %s1266_s27 = sadd.s32 4294967295, %s1190_s26   ;;  %s1190_s26 = sphi %s1245_s26, %s25_s26   ;;  %s1186_s25 = sphi %s1243_s25, %s1498_s25   ;;  %s1182_s24 = sphi %s1241_s24, %s1497_s24   ;;  %s1178_s23 = sphi %s1239_s23, %s1493_s23   ;;  %s1174_s22 = sphi %s1237_s22, %s1496_s22   ;;  %s1170_s21 = sphi %s1235_s21, %s1495_s21  }
   0xb   : > { %1476 = sst [smem:[#allocation15_spill]] %s1178_s23  ;;  %s867_s28 = sadd.s32 4294967294, %s1190_s26  }
   0xc   : > { %p59_p0 = scmp.ne.s32.totalorder %s1174_s22, %s1170_s21  ;;  %p60_p1 = scmp.eq.s32.totalorder %s1266_s27, 0 }
   0xd   : > { %p197_p2 = scmp.eq.s32.totalorder %s1266_s27, 1  ;;  %p203_p3 = scmp.eq.s32.totalorder %s867_s28, 1 }
   0xe   : > { %p1275_p4 = por %p60_p1, %p59_p0  ;;  %p868_p5 = scmp.ge.s32.totalorder %s1190_s26, 1 }
   0xf   : > { %p1280_p6 = por %p203_p3, %p59_p0  ;;  %p210_p7 = scmp.lt.s32.totalorder %s1190_s26, 3 }
  0x10   : > { %s1480_s2 = sld [smem:[#allocation20_spill]]  ;;  %s1192_s11 = smov [#allocation8]  }
  0x11   : > { %s1478_s30 = scalar_select %p1280_p6, 1, 0 }
  0x12   : > { %p1288_p8 = pnand %p868_p5, %p210_p7  ;;  %s223_s12 = sshll.u32 %s1192_s11, 4  ;;  %s224_s12 = int_to_ptr.vmem [resolvable:$true] %s223_s12 }
  0x13   : > { %1479 = sst [smem:[#allocation16_spill]] %s1478_s30  ;;  %p870_p11 = scmp.ge.s32.totalorder %s1190_s26, 2 }
  0x14   : > { %p918_p9 = pneg %p1288_p8  ;;  %s1466_s13 = smov 128  }
  0x15   : > { %s1467_s14 = smov 8   ;;  %s37_s15 = sadd.s32 1, %s1186_s25 }
  0x16   : > { %s221_s9 = sshll.u32 %s1480_s2, 4  ;;  %p919_p10 = pnand %p918_p9, %p60_p1  ;;  %s222_s9 = int_to_ptr.hbm [resolvable:$true] %s221_s9 }
  0x17   : > { %p39_p12 = scmp.ge.s32.totalorder %s37_s15, 2  ;;  %s46_s16 = sadd.s32 1, %s1178_s23 }
  0x18   : > { %921 = dma.hbm_to_vmem [thread:$0]  (!%p919_p10), %s222_s9, 1536, %s224_s12, [#allocation7], %s1466_s13, %s1466_s13, %s1467_s14  }
  0x19   : > { %p53_p13 = scmp.ne.s32.totalorder %s1178_s23, %s1174_s22  ;;  %p54_p0 = scmp.eq.s32.totalorder %s1190_s26, 0 }
  0x1a   : > { %s1500_s15 = smov (%p39_p12, %s37_s15), 0  ;;  %p934_p7 = scmp.lt.s32.totalorder %s1190_s26, 2 }
  0x1b   : > { %1482 = sst [smem:[#allocation17_spill]] %s1500_s15  ;;  %p1307_p3 = por %p54_p0, %p53_p13 }
  0x1c   : > { %p1313_p5 = por %p197_p2, %p53_p13  ;;  %s41_s19 = ssub.s32 %s1186_s25, %s1500_s15 }
  0x1d   : > { %p44_p9 = scmp.eq.s32.totalorder %s41_s19, 0  ;;  %s246_s20 = sand.u32 1, %s1178_s23  }
  0x1e   : > { %s1484_s18 = scalar_select %p1313_p5, 1, 0 }
  0x1f   : > { %s871_s28 = sshll.u32 %s246_s20, 4  ;;  %s902_s8 = sshll.u32 %s1186_s25, 5 }
  0x20   : > { %1485 = sst [smem:[#allocation18_spill]] %s1484_s18  ;;  %s257_s12 = scalar_lea.hbm %s1459_s0, %s902_s8 }
  0x21   : > { %s1322_s7 = scalar_select %p44_p9, %s1178_s23, %s46_s16  }
  0x22   : > { %s250_s13 = scalar_lea.vmem [#allocation3], %s871_s28  ;;  %s258_s2 = sshll.u32 %s257_s12, 4  ;;  %s259_s2 = int_to_ptr.hbm [resolvable:$true] %s258_s2 }
  0x23   : > { %1486 = sst [smem:[#allocation19_spill]] %s1322_s7  ;;  %s260_s14 = sshll.u32 %s250_s13, 4  ;;  %s261_s14 = int_to_ptr.vmem [resolvable:$true] %s260_s14 }
  0x24   : > { %p923_p2 = pnand %p934_p7, %p1307_p3  ;;  %s270_s15 = sand.u32 1, %s1190_s26  }
  0x25   : > { %s874_s30 = sshll.u32 %s246_s20, 3  ;;  %s247_s19 = scalar_lea.sflag [#allocation4], %s246_s20 }
  0x26   : > { %s1487_s21 = smov 8   ;;  %s1488_s18 = smov 128  }
  0x27   : > { %925 = dma.hbm_to_vmem [thread:$0]  (!%p923_p2), %s259_s2, 256, %s261_s14, %s247_s19, %s1488_s18, %s1488_s18, %s1487_s21  }
  0x28   : > { %s875_s16 = sshll.u32 %s1186_s25, 3  ;;  %s274_s8 = scalar_lea.vmem [#allocation6], %s874_s30 }
  0x29   : > { %s279_s9 = scalar_lea.hbm %s1460_s1, %s875_s16  ;;  %s283_s28 = sshll.u32 %s274_s8, 4  ;;  %s284_s28 = int_to_ptr.vmem [resolvable:$true] %s283_s28 }
  0x2a   : > { %s281_s13 = sshll.u32 %s279_s9, 4  ;;  %s271_s11 = scalar_lea.sflag [#allocation7], %s270_s15  ;;  %s282_s13 = int_to_ptr.hbm [resolvable:$true] %s281_s13 }
  0x2b   : > { %928 = dma.hbm_to_vmem [thread:$0]  (!%p923_p2), %s282_s13, 128, %s284_s28, %s271_s11  }
  0x2c   : > { %292 = sbr.rel (%p1288_p8) target bundleno = 772 (0x304), region = 44  ;;  %s1341_s17 = sand.u32 (!%p1288_p8), 1, %s1174_s22  }
  0x2d   : > { %s877_s2 = sshll.u32 (!%p1288_p8), %s1341_s17, 4  ;;  %s295_s21 = scalar_lea.sflag (!%p1288_p8), [#allocation4], %s1341_s17 }
  0x2e   : > { %s298_s23 = scalar_lea.vmem (!%p1288_p8), [#allocation3], %s877_s2 }
  0x31   : > { %1153 = dma.done.wait (%p1275_p4), %s295_s21, 256  }
  0x32   : > { %1155 = vsyncadd (%p1275_p4), %s295_s21, 4294967040  ;;  %s304_s30 = sand.u32 1, %s1266_s27   ;;  %s878_s10 = sshll.u32 %s1341_s17, 3 }
  0x33   : > { %s305_s14 = scalar_lea.sflag [#allocation7], %s304_s30  ;;  %s308_s15 = scalar_lea.vmem [#allocation6], %s878_s10 }
  0x34   : > { %1157 = dma.done.wait (%p1275_p4), %s305_s14, 128  }
  0x35   : > { %1159 = vsyncadd (%p1275_p4), %s305_s14, 4294967168 }
  0x36   : > { %1161 = dma.done.wait (%p60_p1), [#allocation7], 1536  }
  0x37   : > { %1163 = vsyncadd (%p60_p1), [#allocation7], 4294965760  ;;  %vm352_vm0 = vcmask 261120   ;;  %v350_v0 = vld [vmem:[%s298_s23] sm:$0xff]  ;;  %v351_v1 = vld [vmem:[%s298_s23 + $0x8] sm:$0xff]  ;;  %vm366_vm1 = vcmask 130048  }
  0x38   : > { %v355_v2 = vld [vmem:[%s308_s15] sm:$0xff]  ;;  %353 = vst.msk [vmem:[#allocation2] sm:$0xff] %vm352_vm0, %v350_v0  ;;  %v365_v3 = vld [vmem:[#allocation8 + $0x28] sm:$0xff]  ;;  %v364_v4 = vld [vmem:[#allocation8 + $0x20] sm:$0xff]  ;;  %s1195_s27 = smov 112   ;;  %s1196_s29 = smov 16  }
  0x39   : > { %354 = vst.msk [vmem:[#allocation2 + $0x8] sm:$0xff] %vm352_vm0, %v351_v1  ;;  %904 = vmatpush.msra.mxu2 %v365_v3  ;;  %v429_v5 = vld [vmem:[#allocation8 + $0x48] sm:$0xff]  ;;  %v359_v7 = vld [vmem:[#allocation8] sm:$0xff]  ;;  %387 = vmatpush.msra.mxu0 %v365_v3  ;;  %v466_v8 = vld [vmem:[#allocation8 + $0x38] sm:$0xff]  ;;  %s903_s9 = sshll.u32 %s1182_s24, 4  ;;  %s347_s8 = scalar_lea.vmem [#allocation9], %s877_s2 }
  0x3a   : > { %v360_v6 = vld [vmem:[#allocation8 + $0x8] sm:$0xff]  ;;  %356 = vst.msk [vmem:[#allocation2 + $0x10] sm:$0xff] %vm352_vm0, %v355_v2  ;;  %v428_v9 = vld [vmem:[#allocation8 + $0x40] sm:$0xff]  ;;  %v465_v10 = vld [vmem:[#allocation8 + $0x30] sm:$0xff]  ;;  %s742_s11 = scalar_lea.hbm %s1465_s6, %s903_s9  ;;  %s743_s23 = sshll.u32 %s347_s8, 4  ;;  %s744_s23 = int_to_ptr.vmem [resolvable:$true] %s743_s23 }
  0x3b   : > { %906 = vmatpush.msra.mxu3 %v360_v6  ;;  %416 = vmatpush.msra.mxu1 %v360_v6  ;;  %v463_v17 = vld [vmem:[#allocation8 + $0x18] sm:$0xff]  ;;  %v462_v19 = vld [vmem:[#allocation8 + $0x10] sm:$0xff]  ;;  %s745_s24 = sshll.u32 %s742_s11, 4  ;;  %s729_s30 = scalar_lea.sflag [#allocation5], %s1341_s17  ;;  %s746_s24 = int_to_ptr.hbm [resolvable:$true] %s745_s24 }
  0x3c   : > { %905 = vmatpush.msra.mxu2 %v364_v4  ;;  %388 = vmatpush.msra.mxu0 %v364_v4  ;;  %v531_v18 = vld [vmem:[#allocation8 + $0x58] sm:$0xff]  ;;  %v530_v20 = vld [vmem:[#allocation8 + $0x50] sm:$0xff]  ;;  %s1114_s2 = sshra.s32 %s746_s24, 4  ;;  %s1115_s2 = int_to_ptr.hbm [resolvable:$true] %s1114_s2 }
  0x3d   : > { %907 = vmatpush.msra.mxu3 %v359_v7  ;;  %417 = vmatpush.msra.mxu1 %v359_v7  ;;  %v993_v43 = vld [vmem:[%s1462_s3] ss:$0 sm:$0xff]  ;;  %s1116_s10 = scalar_lea.hbm %s1115_s2, 16  ;;  %p1121_p10 = scmp.lt.s32.totalorder %s1115_s2, %s1465_s6 }
  0x3e   : > { %450 = vmatpush.msrb.mxu2 %v429_v5  ;;  %520 = vmatpush.msrb.mxu0 %v463_v17  ;;  %p1117_p1 = scmp.ne.s32.totalorder %s1115_s2, %s1116_s10 }
  0x3f   : > { %489 = vmatpush.msrb.mxu3 %v466_v8  ;;  %v357_v11 = vld [vmem:[#allocation2] sm:$0xff]  ;;  %554 = vmatpush.msrb.mxu1 %v531_v18 }
  0x40   : > { %451 = vmatpush.msrb.mxu2 %v428_v9  ;;  %v1364_v12 = vld [vmem:[#allocation2 + $0x1] sm:$0xff]  ;;  %883 = vmatmul.msk.f32.vlgmr.msra.gmra.mxu1 %vm366_vm1, %v357_v11  ;;  %p1118_p4 = pnand %p1117_p1, %p1313_p5 }
  0x41   : > { %490 = vmatpush.msrb.mxu3 %v465_v10  ;;  %v358_v13 = vld [vmem:[#allocation2 + $0x8] sm:$0xff]  ;;  %467 = vrot.lane.b32.xlu0 %v1364_v12, %s1195_s27 }
  0x42   : > { %v1368_v14 = vld [vmem:[#allocation2 + $0x9] sm:$0xff]  ;;  %500 = vrot.lane.b32.xlu2 %v358_v13, %s1195_s27  ;;  %884 = vmatmul.msk.f32.vlgmr.msra.gmra.mxu3 %vm366_vm1, %v358_v13  ;;  %p1119_p8 = pneg %p1118_p4 }
  0x43   : > { %469 = vrot.lane.b32.xlu1 %v1368_v14, %s1195_s27  ;;  %882 = vmatmul.msk.f32.vlgmr.msra.gmra.mxu2 %vm366_vm1, %v1368_v14  ;;  %v426_v15 = vld [vmem:[#allocation2 + $0xa] sm:$0xff]  ;;  %v425_v16 = vld [vmem:[#allocation2 + $0x2] sm:$0xff] }
  0x44   : > { %881 = vmatmul.msk.f32.vlgmr.msra.gmra.mxu0 %vm366_vm1, %v1364_v12  ;;  %555 = vmatpush.msrb.mxu1 %v530_v20 }
  0x45   : > { %521 = vmatpush.msrb.mxu0 %v462_v19 }
  0x49   : > { %498 = vrot.lane.b32.xlu0 %v357_v11, %s1195_s27 }
  0x4a   : > { %534 = vrot.lane.b32.xlu2 %v426_v15, %s1195_s27 }
  0x4b   : > { %532 = vrot.lane.b32.xlu1 %v425_v16, %s1195_s27  ;;  %885 = vmatmul.msk.f32.vlgmr.msrb.gmra.mxu2 %vm366_vm1, %v425_v16  ;;  %s1120_s27 = scalar_lea.hbm %s1465_s6, 32 }
  0x4c   : > { %p1122_p12 = scmp.lt.s32.totalorder %s1120_s27, %s1116_s10 }
  0x4e   : > { %p1123_p13 = por %p1122_p12, %p1121_p10 }
  0x50   : > { %p1124_p0 = pnand %p1123_p13, %p1119_p8 }
  0x53   : > { %886 = vmatmul.msk.f32.gmra.mxu2 %vm366_vm1, %v426_v15 }
  0x9c   : > { %v501_v23 = vpop.permute.xlu2 %500 }
  0xa4   : > { %v535_v26 = vpop.permute.xlu2 %534 }
  0xb3   : > { %v468_v21 = vpop.permute.xlu0 %467 }
  0xb4   : > { %887 = vmatmul.msk.f32.vlgmr.msrb.gmra.mxu3 %vm366_vm1, %v468_v21 }
  0xb5   : > { %v470_v22 = vpop.permute.xlu1 %469 }
  0xbb   : > { %v499_v24 = vpop.permute.xlu0 %498 }
  0xbc   : > { %888 = vmatmul.msk.f32.gmra.mxu3 %vm366_vm1, %v470_v22  ;;  %889 = vmatmul.msk.f32.vlgmr.msrb.gmra.mxu0 %vm366_vm1, %v499_v24 }
  0xbd   : > { %v533_v25 = vpop.permute.xlu1 %532  ;;  %v419_v29 = vpop.f32.mrf.mxu1 }
  0xbe   : > { %891 = vmatmul.msk.f32.vlgmr.msrb.gmra.mxu1 %vm366_vm1, %v533_v25 }
  0xc1   : > { %v390_v28 = vpop.f32.mrf.mxu0 }
  0xc2   : > { %v420_v42 = vadd.f32 %v419_v29, %v390_v28 }
  0xc4   : > { %890 = vmatmul.msk.f32.gmra.mxu0 %vm366_vm1, %v501_v23 }
  0xc5   : > { %v422_v27 = vpop.f32.mrf.mxu3 }
  0xc6   : > { %892 = vmatmul.msk.f32.gmra.mxu1 %vm366_vm1, %v535_v26  ;;  %v393_v40 = vpop.f32.mrf.mxu2 }
  0xc7   : > { %v423_v48 = vadd.f32 %v422_v27, %v393_v40 }
  0xce   : > { %v453_v41 = vpop.f32.mrf.mxu2 }
  0xcf   : > { %v459_v44 = vadd.f32 %v453_v41, %v420_v42 }
  0xd6   : > { %v456_v49 = vpop.f32.mrf.mxu2 }
  0xd7   : > { %v460_v52 = vadd.f32 %v456_v49, %v423_v48 }
 0x137   : > { %v492_v30 = vpop.f32.mrf.mxu3 }
 0x139   : > { %v523_v31 = vpop.f32.mrf.mxu0 }
 0x13a   : > { %v524_v32 = vadd.f32 %v523_v31, %v492_v30 }
 0x13b   : > { %v557_v33 = vpop.f32.mrf.mxu1 }
 0x13c   : > { %v563_v34 = vadd.f32 %v557_v33, %v524_v32 }
 0x13e   : > { %567 = vrot.lane.b32.xlu0 %v563_v34, %s1196_s29 }
 0x13f   : > { %v495_v35 = vpop.f32.mrf.mxu3 }
 0x141   : > { %v526_v36 = vpop.f32.mrf.mxu0 }
 0x142   : > { %v527_v37 = vadd.f32 %v526_v36, %v495_v35 }
 0x143   : > { %v560_v38 = vpop.f32.mrf.mxu1 }
 0x144   : > { %v564_v39 = vadd.f32 %v560_v38, %v527_v37 }
 0x146   : > { %569 = vrot.lane.b32.xlu1 %v564_v39, %s1196_s29 }
 0x1b0   : > { %v568_v45 = vpop.permute.xlu0 %567 }
 0x1b1   : > { %v573_v46 = vsel %vm366_vm1, %v459_v44, %v568_v45 }
 0x1b2   : > { %v1388_v47 = vadd.f32 %v993_v43, %v573_v46 }
 0x1b4   : > { %v1391_v50 = vmul.f32 0.70710677, %v1388_v47  ;;  %v581_v49 = vmul.f32 0.5, %v1388_v47 }
 0x1b6   : > { %v585_v51 = vand.u32 2147483647, %v1391_v50  ;;  %vm651_vm10 = vcmp.ge.f32.partialorder %v1391_v50, 0.0 }
 0x1b8   : > { %v587_v53 = vmul.f32 0.3275911, %v585_v51  ;;  %v570_v54 = vpop.permute.xlu1 %569  ;;  %v639_v8 = vsub.f32 0.0, %v585_v51 }
 0x1b9   : > { %v574_v55 = vsel %vm366_vm1, %v460_v52, %v570_v54 }
 0x1ba   : > { %v589_v56 = vadd.f32 1.0, %v587_v53  ;;  %v1395_v57 = vadd.f32 %v993_v43, %v574_v55  ;;  %v641_v17 = vmul.f32 %v639_v8, %v585_v51 }
 0x1bc   : > { %996 = vrcp.f32 %v589_v56  ;;  %v1398_v58 = vmul.f32 0.70710677, %v1395_v57  ;;  %v602_v1 = vand.u32 2147483648, %v589_v56  ;;  %v600_v3 = vand.u32 2147483647, %v589_v56 }
 0x1bd   : > { %vm596_vm3 = vweird.f32 %v589_v56  ;;  %v643_v24 = vmul.f32 1.442695, %v641_v17  ;;  %v582_v50 = vmul.f32 0.5, %v1395_v57 }
 0x1be   : > { %v586_v59 = vand.u32 2147483647, %v1398_v58  ;;  %v603_v5 = vor.u32 1.1754944e-38, %v602_v1  ;;  %vm601_vm5 = vcmp.eq.f32.partialorder %v600_v3, 8.507059e+37  ;;  %vm652_vm11 = vcmp.ge.f32.partialorder %v1398_v58, 0.0 }
 0x1c0   : > { %v588_v60 = vmul.f32 0.3275911, %v586_v59  ;;  %v640_v26 = vsub.f32 0.0, %v586_v59 }
 0x1c2   : > { %v997_v61 = vpop.eup %996  ;;  %v590_v63 = vadd.f32 1.0, %v588_v60  ;;  %v642_v32 = vmul.f32 %v640_v26, %v586_v59 }
 0x1c3   : > { %v592_v62 = vmul.f32 %v997_v61, %v589_v56  ;;  %vm597_vm2 = vweird.f32 %v997_v61 }
 0x1c4   : > { %998 = vrcp.f32 %v590_v63  ;;  %vm598_vm4 = vmor %vm596_vm3, %vm597_vm2  ;;  %v617_v15 = vand.u32 2147483648, %v590_v63  ;;  %v615_v19 = vand.u32 2147483647, %v590_v63  ;;  %vm611_vm7 = vweird.f32 %v590_v63 }
 0x1c5   : > { %v593_v0 = vsub.f32 1.0, %v592_v62  ;;  %1000 = vpow2.f32 %v643_v24  ;;  %v645_v37 = vmul.f32 1.442695, %v642_v32 }
 0x1c6   : > { %v618_v23 = vor.u32 1.1754944e-38, %v617_v15  ;;  %vm616_vm9 = vcmp.eq.f32.partialorder %v615_v19, 8.507059e+37 }
 0x1c7   : > { %v594_v2 = vmul.f32 %v997_v61, %v593_v0  ;;  %1002 = vpow2.f32 %v645_v37 }
 0x1c9   : > { %v595_v4 = vadd.f32 %v997_v61, %v594_v2  ;;  %v1197_v2 = vmov 32.0  }
 0x1ca   : > { %v999_v6 = vpop.eup %998  ;;  %1004 = vrcp.f32 %v1197_v2 }
 0x1cb   : > { %v599_v7 = vsel %vm598_vm4, %v997_v61, %v595_v4  ;;  %v607_v9 = vmul.f32 %v999_v6, %v590_v63  ;;  %vm612_vm6 = vweird.f32 %v999_v6  ;;  %v1001_v39 = vpop.eup %1000 }
 0x1cc   : > { %v604_v10 = vsel %vm601_vm5, %v603_v5, %v599_v7  ;;  %vm613_vm8 = vmor %vm611_vm7, %vm612_vm6 }
 0x1cd   : > { %v621_v11 = vmul.f32 1.0614054, %v604_v10  ;;  %v608_v13 = vsub.f32 1.0, %v607_v9  ;;  %v1003_v53 = vpop.eup %1002 }
 0x1cf   : > { %v893_v16 = vadd.f32 -1.4531521, %v621_v11  ;;  %v609_v18 = vmul.f32 %v999_v6, %v608_v13 }
 0x1d1   : > { %v625_v20 = vmul.f32 %v893_v16, %v604_v10  ;;  %v610_v21 = vadd.f32 %v999_v6, %v609_v18 }
 0x1d3   : > { %v627_v22 = vadd.f32 1.4214138, %v625_v20  ;;  %v614_v25 = vsel %vm613_vm8, %v999_v6, %v610_v21 }
 0x1d4   : > { %v619_v28 = vsel %vm616_vm9, %v618_v23, %v614_v25 }
 0x1d5   : > { %v629_v27 = vmul.f32 %v627_v22, %v604_v10  ;;  %v622_v29 = vmul.f32 1.0614054, %v619_v28 }
 0x1d7   : > { %v895_v30 = vadd.f32 -0.28449672, %v629_v27  ;;  %v894_v31 = vadd.f32 -1.4531521, %v622_v29 }
 0x1d9   : > { %v633_v33 = vmul.f32 %v895_v30, %v604_v10  ;;  %v626_v34 = vmul.f32 %v894_v31, %v619_v28  ;;  %v994_v30 = vld [vmem:[%s1463_s4] ss:$0 sm:$0xff] }
 0x1db   : > { %v635_v35 = vadd.f32 0.2548296, %v633_v33  ;;  %v628_v36 = vadd.f32 1.4214138, %v626_v34  ;;  %v995_v33 = vld [vmem:[%s1464_s5] ss:$0 sm:$0xff] }
 0x1dd   : > { %v637_v38 = vmul.f32 %v635_v35, %v604_v10  ;;  %v630_v40 = vmul.f32 %v628_v36, %v619_v28 }
 0x1df   : > { %v647_v41 = vmul.f32 %v1001_v39, %v637_v38  ;;  %v896_v42 = vadd.f32 -0.28449672, %v630_v40 }
 0x1e1   : > { %v649_v43 = vsub.f32 1.0, %v647_v41  ;;  %v634_v44 = vmul.f32 %v896_v42, %v619_v28 }
 0x1e3   : > { %v653_v45 = vsub.f32 0.0, %v649_v43  ;;  %v636_v46 = vadd.f32 0.2548296, %v634_v44 }
 0x1e5   : > { %v655_v48 = vsel %vm651_vm10, %v649_v43, %v653_v45  ;;  %v638_v52 = vmul.f32 %v636_v46, %v619_v28 }
 0x1e6   : > { %v657_v51 = vadd.f32 1.0, %v655_v48 }
 0x1e7   : > { %v648_v55 = vmul.f32 %v1003_v53, %v638_v52 }
 0x1e8   : > { %v659_v54 = vmul.f32 %v657_v51, %v581_v49 }
 0x1e9   : > { %v650_v59 = vsub.f32 1.0, %v648_v55 }
 0x1ea   : > { %v661_v56 = vadd.f32 %v659_v54, %v1364_v12  ;;  %v1005_v12 = vpop.eup %1004 }
 0x1eb   : > { %v654_v61 = vsub.f32 0.0, %v650_v59  ;;  %v670_v3 = vmul.f32 32.0, %v1005_v12  ;;  %vm674_vm12 = vweird.f32 %v1005_v12 }
 0x1ec   : > { %v663_v60 = vsel %vm352_vm0, %v661_v56, 0.0 }
 0x1ed   : > { %664 = vadd.xlane.f32.xlu2 %v663_v60  ;;  %v656_v62 = vsel %vm652_vm11, %v650_v59, %v654_v61  ;;  %v671_v4 = vsub.f32 1.0, %v670_v3 }
 0x1ee   : > { %v658_v63 = vadd.f32 1.0, %v656_v62 }
 0x1ef   : > { %v672_v5 = vmul.f32 %v1005_v12, %v671_v4 }
 0x1f0   : > { %v660_v0 = vmul.f32 %v658_v63, %v582_v50 }
 0x1f1   : > { %v673_v6 = vadd.f32 %v1005_v12, %v672_v5 }
 0x1f2   : > { %v662_v47 = vadd.f32 %v660_v0, %v1368_v14 }
 0x1f3   : > { %v675_v58 = vsel %vm674_vm12, %v1005_v12, %v673_v6 }
 0x1f4   : > { %v666_v1 = vsel %vm352_vm0, %v662_v47, 0.0 }
 0x1f5   : > { %667 = vadd.xlane.f32.xlu0 %v666_v1 }
 0x260   : > { %v665_v7 = vpop.xlane.xlu2 %664 }
 0x261   : > { %v676_v8 = vmul.f32 %v675_v58, %v665_v7 }
 0x263   : > { %v678_v9 = vsub.f32 %v661_v56, %v676_v8 }
 0x265   : > { %v680_v57 = vmul.f32 %v678_v9, %v678_v9 }
 0x267   : > { %v682_v10 = vsel %vm352_vm0, %v680_v57, 0.0 }
 0x268   : > { %683 = vadd.xlane.f32.xlu1 %v682_v10  ;;  %v668_v14 = vpop.xlane.xlu0 %667 }
 0x269   : > { %v677_v11 = vmul.f32 %v675_v58, %v668_v14 }
 0x26b   : > { %v679_v13 = vsub.f32 %v662_v47, %v677_v11 }
 0x26d   : > { %v681_v15 = vmul.f32 %v679_v13, %v679_v13 }
 0x26f   : > { %v685_v16 = vsel %vm352_vm0, %v681_v15, 0.0 }
 0x270   : > { %686 = vadd.xlane.f32.xlu2 %v685_v16 }
 0x2db   : > { %v684_v17 = vpop.xlane.xlu1 %683 }
 0x2dc   : > { %v688_v18 = vmul.f32 %v684_v17, %v675_v58 }
 0x2de   : > { %v690_v19 = vadd.f32 1e-05, %v688_v18 }
 0x2e0   : > { %1006 = vrsqrt.f32 %v690_v19  ;;  %vm698_vm14 = vweird.f32 %v690_v19 }
 0x2e3   : > { %v687_v20 = vpop.xlane.xlu2 %686 }
 0x2e4   : > { %v689_v21 = vmul.f32 %v687_v20, %v675_v58 }
 0x2e6   : > { %v1007_v22 = vpop.eup %1006  ;;  %v691_v24 = vadd.f32 1e-05, %v689_v21 }
 0x2e7   : > { %v693_v23 = vmul.f32 %v1007_v22, %v690_v19  ;;  %vm699_vm13 = vweird.f32 %v1007_v22 }
 0x2e8   : > { %1008 = vrsqrt.f32 %v691_v24  ;;  %vm700_vm15 = vmor %vm698_vm14, %vm699_vm13  ;;  %vm708_vm2 = vweird.f32 %v691_v24 }
 0x2e9   : > { %v694_v25 = vmul.f32 %v1007_v22, %v693_v23 }
 0x2eb   : > { %v695_v26 = vmul.f32 0.5, %v694_v25 }
 0x2ed   : > { %v696_v27 = vsub.f32 1.5, %v695_v26 }
 0x2ee   : > { %v1009_v28 = vpop.eup %1008 }
 0x2ef   : > { %v697_v29 = vmul.f32 %v1007_v22, %v696_v27  ;;  %v703_v31 = vmul.f32 %v1009_v28, %v691_v24  ;;  %vm709_vm1 = vweird.f32 %v1009_v28 }
 0x2f0   : > { %vm710_vm3 = vmor %vm708_vm2, %vm709_vm1 }
 0x2f1   : > { %v701_v32 = vsel %vm700_vm15, %v1007_v22, %v697_v29  ;;  %v704_v35 = vmul.f32 %v1009_v28, %v703_v31 }
 0x2f2   : > { %v712_v34 = vmul.f32 %v701_v32, %v678_v9 }
 0x2f3   : > { %v705_v37 = vmul.f32 0.5, %v704_v35 }
 0x2f4   : > { %v718_v36 = vmul.f32 %v994_v30, %v712_v34 }
 0x2f5   : > { %v706_v39 = vsub.f32 1.5, %v705_v37 }
 0x2f6   : > { %v724_v38 = vadd.f32 %v995_v33, %v718_v36 }
 0x2f7   : > { %v707_v40 = vmul.f32 %v1009_v28, %v706_v39 }
 0x2f8   : > { %726 = vst.msk [vmem:[%s347_s8] sm:$0xff] %vm352_vm0, %v724_v38 }
 0x2f9   : > { %v711_v41 = vsel %vm710_vm3, %v1009_v28, %v707_v40 }
 0x2fa   : > { %v713_v42 = vmul.f32 %v711_v41, %v679_v13 }
 0x2fc   : > { %v719_v43 = vmul.f32 %v994_v30, %v713_v42 }
 0x2fe   : > { %v725_v44 = vadd.f32 %v995_v33, %v719_v43 }
 0x300   : > { %727 = vst.msk [vmem:[%s347_s8 + $0x8] sm:$0xff] %vm352_vm0, %v725_v44 }
 0x301   : > { %1127 = shalt.err (!%p1124_p0)
}
 0x302   : > { %s1198_s17 = smov 128   ;;  %s1199_s20 = smov 8  }
 0x303   : > { %916 = dma.vmem_to_hbm [thread:$0]  (%p1313_p5), %s744_s23, 256, %s746_s24, %s729_s30, %s1198_s17, %s1198_s17, %s1199_s20  }
 0x304 PF: > { %s1490_s7 = sld [smem:[#allocation14_spill]]  ;;  %p930_p3 = pnand %p870_p11, %p1280_p6 }
 0x306   : > { %p931_p7 = pneg %p930_p3 }
 0x30a   : > { %s760_s19 = sand.u32 1, %s1490_s7  }
 0x30b   : > { %s761_s16 = scalar_lea.sflag [#allocation5], %s760_s19 }
 0x30c   : > { %1165 = dma.done.wait (%p931_p7), %s761_s16, 256  }
 0x30d   : > { %1167 = vsyncadd (%p931_p7), %s761_s16, 4294967040  ;;  %s25_s26 = sadd.s32 1, %s1190_s26   ;;  %s1492_s9 = sld [smem:[#allocation15_spill]] }
 0x30e   : > { %p22_p9 = scmp.ge.s32.totalorder %s25_s26, 4   ;;  %s1493_s23 = sld [smem:[#allocation19_spill]] }
 0x30f   : > { %s1494_s8 = sld [smem:[#allocation17_spill]]  ;;  %s1495_s21 = smov %s1174_s22 }
 0x310   : > { %s1497_s24 = smov %s1186_s25 }
 0x311   :  { %24 = sbr.rel (!%p22_p9) target bundleno = 10 (0xa), region = 111 }
 0x313   : > { %s1496_s22 = smov %s1492_s9 }
 0x315   : > { %s1498_s25 = smov %s1494_s8 }
 0x316   :  { %767 = vsyncpa [#allocation4], 1 }
 0x317   :  { %769 = vsyncpa [#allocation4 + $0x1], 1 }
 0x318   :  { %770 = vsyncpa [#allocation7], 1 }
 0x319   :  { %772 = vsyncpa [#allocation7 + $0x1], 1 }
 0x31a   :  { %773 = vsyncpa [#allocation5], 1 }
 0x31b   :  { %775 = vsyncpa [#allocation5 + $0x1], 1 }

</bundles_post_ra>
